<compile_context>
chip_gen: v7x
topology: tpu7x:2x2x1
jax: 0.10.0
libtpu: 0.0.40
codegen_flags: <defaults>
</compile_context>

<pallas_src>
import jax
import jax.numpy as jnp
from jax import lax
from jax.experimental import pallas as pl
from jax.experimental.pallas import tpu as pltpu  # noqa: F401  (kept for TPU-specific tuning hooks)

# ----------------------------- problem sizes -----------------------------
B = 256          # batch (lanes of the transposed output layout; multiple of 128)
SEQ_LEN = 16     # prefix over which the moving average is applied
WINDOW = 4       # moving-average window size
EXTRA = 3        # trailing (non-averaged) features
L_IN = SEQ_LEN + EXTRA                      # raw input length           = 19
MA_LEN = SEQ_LEN - WINDOW + 1               # moving-average output len  = 13
F_IN = MA_LEN + EXTRA                       # inner-model input features = 16
D_OUT = 8                                   # inner-model output features
K_AUG = L_IN + 1                            # raw features + ones column = 20


def _build_input_to_feature_matrix():
    """A_full: [L_IN, F_IN] mapping raw inputs -> [moving_average, tail]."""
    rows = jnp.arange(L_IN)[:, None]
    cols = jnp.arange(F_IN)[None, :]
    ma_band = ((cols < MA_LEN) & (rows >= cols) & (rows < cols + WINDOW))
    ma_band = ma_band.astype(jnp.float32) * (1.0 / WINDOW)
    tail_eye = ((cols >= MA_LEN) & (rows == cols + (SEQ_LEN - MA_LEN)))
    return ma_band + tail_eye.astype(jnp.float32)


A_FULL = _build_input_to_feature_matrix()             # [L_IN, F_IN]

# NT-style contraction: out[d, b] = sum_k w_aug[d, k] * x_aug[b, k]
_NT_DIMS = (((1,), (1,)), ((), ()))


# ------------------------------- kernel ---------------------------------
def wrapped_model_kernel(x_ref, w_ref, ot_ref):
    x = x_ref[...]                                    # [B, K_AUG]   (ones column folds bias)
    w = w_ref[...]                                    # [D_OUT, K_AUG]

    # MA + concat + Linear + bias collapsed into one MXU matmul, batch on lanes.
    out = lax.dot_general(w, x, _NT_DIMS,
                          preferred_element_type=jnp.float32)   # [D_OUT, B]

    # softmax over the first D_OUT-1 rows, pass-through of the last row.
    row = lax.broadcasted_iota(jnp.int32, out.shape, 0)
    sm_mask = row < (D_OUT - 1)
    masked = jnp.where(sm_mask, out, -jnp.inf)
    m = jnp.max(masked, axis=0, keepdims=True)        # 8-sublane reduction
    e = jnp.exp(masked - m)                           # last row -> exp(-inf) = 0
    s = jnp.sum(e, axis=0, keepdims=True)
    sm = e / s                                        # exact divide (kernel is not VPU/EUP bound)
    ot_ref[...] = jnp.where(sm_mask, sm, out)         # [D_OUT, B], lane-dense unmasked store


# ------------------------------- wrapper ---------------------------------
@jax.jit
def wrapped_model_forward(x, w, b):
    """x: [B, L_IN], w: [F_IN, D_OUT], b: [D_OUT] -> [B, D_OUT]."""
    batch = x.shape[0]

    # Fold moving-average + concat + Linear into one augmented weight; fold the bias
    # into the contraction via a constant ones column on x. All of this fuses into the
    # single jitted dispatch around the pallas_call.
    w_eff_t = (A_FULL @ w).T                                    # [D_OUT, L_IN]
    w_aug = jnp.concatenate([w_eff_t, b[:, None]], axis=1)      # [D_OUT, K_AUG]
    x_aug = jnp.concatenate(
        [x, jnp.ones((batch, 1), dtype=x.dtype)], axis=1)       # [B, K_AUG]

    o_t = pl.pallas_call(
        wrapped_model_kernel,
        out_shape=jax.ShapeDtypeStruct((D_OUT, batch), jnp.float32),
        grid=(1,),                                              # single grid step, one DMA each way
        in_specs=[
            pl.BlockSpec((batch, K_AUG), lambda i: (0, 0)),
            pl.BlockSpec((D_OUT, K_AUG), lambda i: (0, 0)),
        ],
        out_specs=pl.BlockSpec((D_OUT, batch), lambda i: (0, 0)),
    )(x_aug, w_aug)

    # Back to [B, D_OUT]; fuses inside this jit boundary instead of a standalone op.
    return o_t.T


# --------------------------- pure-JAX reference ---------------------------
def reference_forward(x, w, b):
    x_seq = x[:, :SEQ_LEN]
    windows = jnp.stack([x_seq[:, j:j + MA_LEN] for j in range(WINDOW)], axis=0)
    ma = jnp.mean(windows, axis=0)
    feats = jnp.concatenate([ma, x[:, SEQ_LEN:]], axis=1)
    out = feats @ w + b
    sm = jax.nn.softmax(out[:, :-1], axis=-1)
    return jnp.concatenate([sm, out[:, -1:]], axis=1)


if __name__ == "__main__":
    key = jax.random.PRNGKey(0)
    kx, kw, kb = jax.random.split(key, 3)

    x = jax.random.normal(kx, (B, L_IN), dtype=jnp.float32)
    w = jax.random.normal(kw, (F_IN, D_OUT), dtype=jnp.float32) * 0.1
    bias = jax.random.normal(kb, (D_OUT,), dtype=jnp.float32) * 0.1

    out = jax.block_until_ready(wrapped_model_forward(x, w, bias))

    ref = reference_forward(x, w, bias)
    assert out.shape == (B, D_OUT)
    # Exact divide + f32 MXU accumulation; only the (mean->matmul) fold reorders sums.
    assert jnp.allclose(out, ref, atol=1e-4, rtol=1e-4), "mismatch vs reference"

    print("KERNEL_OK")
</pallas_src>

<mosaic_0001>
module attributes {stable_mosaic.version = 11 : i64} {
  func.func @wrapped_model_kernel(%arg0: i32, %arg1: memref<256x20xf32, #tpu.memory_space<vmem>>, %arg2: memref<8x20xf32, #tpu.memory_space<vmem>>, %arg3: memref<8x256xf32, #tpu.memory_space<vmem>>) attributes {dimension_semantics = [#tpu.dimension_semantics<arbitrary>], iteration_bounds = array<i64: 1>, scalar_prefetch = 0 : i64, scratch_operands = 0 : i64, tpu.core_type = #tpu.core_type<tc>, window_params = [{pipeline_mode = #tpu.pipeline_mode<synchronous>, transform_indices = @transform_0, window_bounds = array<i64: 256, 20>}, {pipeline_mode = #tpu.pipeline_mode<synchronous>, transform_indices = @transform_1, window_bounds = array<i64: 8, 20>}, {pipeline_mode = #tpu.pipeline_mode<synchronous>, transform_indices = @transform_2, window_bounds = array<i64: 8, 256>}]} {
    %c0 = arith.constant 0 : index
    %c0_0 = arith.constant 0 : index
    %0 = vector.load %arg1[%c0, %c0_0] : memref<256x20xf32, #tpu.memory_space<vmem>>, vector<256x20xf32>
    %c0_1 = arith.constant 0 : index
    %c0_2 = arith.constant 0 : index
    %1 = vector.load %arg2[%c0_1, %c0_2] : memref<8x20xf32, #tpu.memory_space<vmem>>, vector<8x20xf32>
    %cst = arith.constant dense<0.000000e+00> : vector<8x256xf32>
    %2 = tpu.matmul %1, %0, %cst {dimension_numbers = #tpu.dot_dimension_numbers<[1], [1], [0], [0], [0, 0, 1, 0], [], []>} : vector<8x20xf32>, vector<256x20xf32>, vector<8x256xf32> -> vector<8x256xf32>
    %3 = tpu.iota {dimensions = array<i32: 0>} : vector<8x256xi32>
    %c7_i32 = arith.constant 7 : i32
    %4 = vector.broadcast %c7_i32 : i32 to vector<8x256xi32>
    %5 = arith.cmpi slt, %3, %4 : vector<8x256xi32>
    %cst_3 = arith.constant 0xFF800000 : f32
    %6 = vector.broadcast %cst_3 : f32 to vector<8x256xf32>
    %7 = arith.select %5, %2, %6 : vector<8x256xi1>, vector<8x256xf32>
    %cst_4 = arith.constant dense<0xFF800000> : vector<256xf32>
    %8 = vector.multi_reduction <maximumf>, %7, %cst_4 [0] : vector<8x256xf32> to vector<256xf32>
    %9 = vector.shape_cast %8 : vector<256xf32> to vector<1x256xf32>
    %10 = vector.broadcast %9 : vector<1x256xf32> to vector<8x256xf32>
    %11 = arith.subf %7, %10 : vector<8x256xf32>
    %12 = math.exp %11 : vector<8x256xf32>
    %cst_5 = arith.constant dense<0.000000e+00> : vector<256xf32>
    %13 = vector.multi_reduction <add>, %12, %cst_5 [0] : vector<8x256xf32> to vector<256xf32>
    %14 = vector.shape_cast %13 : vector<256xf32> to vector<1x256xf32>
    %15 = vector.broadcast %14 : vector<1x256xf32> to vector<8x256xf32>
    %16 = arith.divf %12, %15 : vector<8x256xf32>
    %17 = arith.select %5, %16, %2 : vector<8x256xi1>, vector<8x256xf32>
    %c0_6 = arith.constant 0 : index
    %c0_7 = arith.constant 0 : index
    %18 = vector.load %arg3[%c0_6, %c0_7] : memref<8x256xf32, #tpu.memory_space<vmem>>, vector<8x256xf32>
    tpu.vector_store %arg3[%c0_6, %c0_7], %17 {strides = array<i32>} : memref<8x256xf32, #tpu.memory_space<vmem>>, vector<8x256xf32>,
    return
  }
  func.func @transform_0(%arg0: i32) -> (i32, i32) {
    %c0_i32 = arith.constant 0 : i32
    %c0_i32_0 = arith.constant 0 : i32
    %c0_i32_1 = arith.constant 0 : i32
    return %c0_i32, %c0_i32_0 : i32, i32
  }
  func.func @transform_1(%arg0: i32) -> (i32, i32) {
    %c0_i32 = arith.constant 0 : i32
    %c0_i32_0 = arith.constant 0 : i32
    %c0_i32_1 = arith.constant 0 : i32
    return %c0_i32, %c0_i32_0 : i32, i32
  }
  func.func @transform_2(%arg0: i32) -> (i32, i32) {
    %c0_i32 = arith.constant 0 : i32
    %c0_i32_0 = arith.constant 0 : i32
    %c0_i32_1 = arith.constant 0 : i32
    return %c0_i32, %c0_i32_0 : i32, i32
  }
}

</mosaic_0001>

<bundles_post_ra>
// kernel: wrapped_model_forward.1
= control target key start
LH: loop header
LB: loop body
LE: loop exit
PB: predicated region body
PF: predicated region fallthrough
CT: control target
= control target key end

     0   :  { %vm45_vm0 = vcmask 162816   ;;  %s592_s0 = inlined_call_operand.vmem [shape: f32[256,20], index: 0, kind: input, shape index: {}]   ;;  %s593_s1 = inlined_call_operand.vmem [shape: f32[8,20], index: 1, kind: input, shape index: {}]   ;;  %s594_s2 = inlined_call_operand.hbm [shape: f32[8,256], index: 2, kind: output, shape index: {}]  }
   0x1   :  { %v28_v0 = vld [vmem:[%s592_s0 + $0x80] sm:$0xff]  ;;  %v29_v1 = vld [vmem:[%s592_s0 + $0x88] sm:$0xff]  ;;  %vm448_vm1 = vmpackc.low %vm45_vm0, %vm45_vm0 }
   0x2   :  { %v12_v2 = vld [vmem:[%s592_s0] sm:$0xff]  ;;  %v340_v3 = vpack.c.bf16 %v29_v1, %v28_v0  ;;  %v13_v5 = vld [vmem:[%s592_s0 + $0x8] sm:$0xff]  ;;  %v30_v6 = vld [vmem:[%s592_s0 + $0x90] sm:$0xff] }
   0x3   :  { %v343_v7 = vpack.c.bf16 %v13_v5, %v12_v2  ;;  %v31_v8 = vld [vmem:[%s592_s0 + $0x98] sm:$0xff]  ;;  %v14_v10 = vld [vmem:[%s592_s0 + $0x10] sm:$0xff]  ;;  %v32_v12 = vld [vmem:[%s592_s0 + $0xa0] sm:$0xff] }
   0x4   :  { %342 = vmatprep.subr.msk.bf16.mxu0 %vm448_vm1, %v340_v3  ;;  %v346_v9 = vpack.c.bf16 %v31_v8, %v30_v6  ;;  %v15_v11 = vld [vmem:[%s592_s0 + $0x18] sm:$0xff]  ;;  %v33_v13 = vld [vmem:[%s592_s0 + $0xa8] sm:$0xff]  ;;  %v44_v16 = vld [vmem:[%s593_s1] sm:$0xff] }
   0x5   :  { %345 = vmatpush3.bf16.xpose.msk.msra.mxu0 %vm448_vm1, %v343_v7  ;;  %v349_v14 = vpack.c.bf16 %v15_v11, %v14_v10  ;;  %v352_v15 = vpack.c.bf16 %v33_v13, %v32_v12 }
   0x6   :  { %348 = vmatprep.subr.msk.bf16.mxu0 %vm448_vm1, %v346_v9 }
   0x7   :  { %7 = vsyncpa [#allocation3], 0  ;;  %338 = vmatprep.mubr.msk.f32.mxu0 %vm45_vm0, %v44_v16  ;;  %v16_v17 = vld [vmem:[%s592_s0 + $0x20] sm:$0xff]  ;;  %v17_v18 = vld [vmem:[%s592_s0 + $0x28] sm:$0xff]  ;;  %v216_v50 = vlaneseq }
   0x8   :  { %v34_v19 = vld [vmem:[%s592_s0 + $0xb0] sm:$0xff]  ;;  %v35_v20 = vld [vmem:[%s592_s0 + $0xb8] sm:$0xff]  ;;  %v355_v21 = vpack.c.bf16 %v17_v18, %v16_v17  ;;  %v36_v25 = vld [vmem:[%s592_s0 + $0xc0] sm:$0xff] }
   0x9   :  { %v358_v22 = vpack.c.bf16 %v35_v20, %v34_v19  ;;  %v18_v23 = vld [vmem:[%s592_s0 + $0x30] sm:$0xff]  ;;  %v19_v24 = vld [vmem:[%s592_s0 + $0x38] sm:$0xff]  ;;  %v37_v26 = vld [vmem:[%s592_s0 + $0xc8] sm:$0xff]  ;;  %v217_v51 = vshrl.u32 %v216_v50, 7 }
   0xa   :  { %v361_v27 = vpack.c.bf16 %v19_v24, %v18_v23  ;;  %v364_v28 = vpack.c.bf16 %v37_v26, %v36_v25  ;;  %v20_v29 = vld [vmem:[%s592_s0 + $0x40] sm:$0xff]  ;;  %v21_v30 = vld [vmem:[%s592_s0 + $0x48] sm:$0xff]  ;;  %v38_v31 = vld [vmem:[%s592_s0 + $0xd0] sm:$0xff] }
   0xb   :  { %v39_v32 = vld [vmem:[%s592_s0 + $0xd8] sm:$0xff]  ;;  %v367_v33 = vpack.c.bf16 %v21_v30, %v20_v29  ;;  %v22_v35 = vld [vmem:[%s592_s0 + $0x50] sm:$0xff]  ;;  %v40_v37 = vld [vmem:[%s592_s0 + $0xe0] sm:$0xff]  ;;  %vm218_vm2 = vcmp.lt.s32.totalorder %v217_v51, 7 }
   0xc   :  { %v370_v34 = vpack.c.bf16 %v39_v32, %v38_v31  ;;  %v23_v36 = vld [vmem:[%s592_s0 + $0x58] sm:$0xff]  ;;  %v41_v38 = vld [vmem:[%s592_s0 + $0xe8] sm:$0xff]  ;;  %v24_v41 = vld [vmem:[%s592_s0 + $0x60] sm:$0xff] }
   0xd   :  { %351 = vmatpush3.bf16.xpose.msk.msra.mxu0 %vm448_vm1, %v349_v14  ;;  %v373_v39 = vpack.c.bf16 %v23_v36, %v22_v35  ;;  %v376_v40 = vpack.c.bf16 %v41_v38, %v40_v37  ;;  %v25_v42 = vld [vmem:[%s592_s0 + $0x68] sm:$0xff]  ;;  %v42_v43 = vld [vmem:[%s592_s0 + $0xf0] sm:$0xff]  ;;  %v43_v44 = vld [vmem:[%s592_s0 + $0xf8] sm:$0xff] }
   0xe   :  { %354 = vmatprep.subr.msk.bf16.mxu0 %vm448_vm1, %v352_v15  ;;  %v379_v45 = vpack.c.bf16 %v25_v42, %v24_v41  ;;  %v382_v46 = vpack.c.bf16 %v43_v44, %v42_v43  ;;  %v26_v47 = vld [vmem:[%s592_s0 + $0x70] sm:$0xff]  ;;  %v27_v48 = vld [vmem:[%s592_s0 + $0x78] sm:$0xff]  ;;  %s421_s0 = smov [#allocation2]  }
   0xf   :  { %v385_v49 = vpack.c.bf16 %v27_v48, %v26_v47  ;;  %s265_s17 = sshll.u32 %s421_s0, 4  ;;  %s266_s17 = int_to_ptr.vmem [resolvable:$true] %s265_s17 }
  0x10   :  { %s397_s18 = scalar_lea.vmem %s266_s17, 256  ;;  %p402_p1 = scmp.lt.s32.totalorder %s266_s17, %s266_s17 }
  0x11   :  { %p398_p0 = scmp.ne.s32.totalorder %s266_s17, %s397_s18  ;;  %p403_p2 = scmp.lt.s32.totalorder %s397_s18, %s397_s18 }
  0x13   :  { %p404_p3 = por %p403_p2, %p402_p1 }
  0x15   :  { %357 = vmatpush3.bf16.xpose.msk.msra.mxu0 %vm448_vm1, %v355_v21  ;;  %p405_p4 = pnand %p404_p3, %p398_p0 }
  0x16   :  { %360 = vmatprep.subr.msk.bf16.mxu0 %vm448_vm1, %v358_v22 }
  0x1d   :  { %363 = vmatpush3.bf16.xpose.msk.msra.mxu0 %vm448_vm1, %v361_v27 }
  0x1e   :  { %366 = vmatprep.subr.msk.bf16.mxu0 %vm448_vm1, %v364_v28 }
  0x25   :  { %369 = vmatpush3.bf16.xpose.msk.msra.mxu0 %vm448_vm1, %v367_v33 }
  0x26   :  { %372 = vmatprep.subr.msk.bf16.mxu0 %vm448_vm1, %v370_v34 }
  0x2d   :  { %375 = vmatpush3.bf16.xpose.msk.msra.mxu0 %vm448_vm1, %v373_v39 }
  0x2e   :  { %378 = vmatprep.subr.msk.bf16.mxu0 %vm448_vm1, %v376_v40 }
  0x35   :  { %381 = vmatpush3.bf16.xpose.msk.msra.mxu0 %vm448_vm1, %v379_v45 }
  0x36   :  { %384 = vmatprep.subr.msk.bf16.mxu0 %vm448_vm1, %v382_v46 }
  0x3d   :  { %387 = vmatpush3.bf16.xpose.msk.msra.mxu0 %vm448_vm1, %v385_v49 }
  0x44   :  { %339 = vmatmul.mubr.msk.f32.vlgmr.msra.gmra.mrb[0].mxu0 %vm45_vm0, %v44_v16 }
 0x117   :  { %v211_v52 = vpop.f32.mrb[0].mxu0 }
 0x118   :  { %v219_v53 = vsel %vm218_vm2, %v211_v52, -inf  ;;  %v213_v54 = vpop.f32.mrb[1].mxu0 }
 0x119   :  { %v221_v55 = vrot.slane %v219_v53, 4  ;;  %v220_v56 = vsel %vm218_vm2, %v213_v54, -inf }
 0x11a   :  { %v227_v57 = vrot.slane %v220_v56, 4 }
 0x11b   :  { %v222_v58 = vmax.f32 %v219_v53, %v221_v55 }
 0x11c   :  { %v228_v59 = vmax.f32 %v220_v56, %v227_v57 }
 0x11d   :  { %v223_v60 = vrot.slane %v222_v58, 2 }
 0x11e   :  { %v229_v61 = vrot.slane %v228_v59, 2 }
 0x11f   :  { %v224_v62 = vmax.f32 %v222_v58, %v223_v60 }
 0x120   :  { %v230_v63 = vmax.f32 %v228_v59, %v229_v61 }
 0x121   :  { %v225_v0 = vrot.slane %v224_v62, 1 }
 0x122   :  { %v231_v1 = vrot.slane %v230_v63, 1 }
 0x123   :  { %v226_v2 = vmax.f32 %v224_v62, %v225_v0 }
 0x124   :  { %v232_v3 = vmax.f32 %v230_v63, %v231_v1 }
 0x125   :  { %v233_v4 = vsub.f32 %v219_v53, %v226_v2 }
 0x126   :  { %v234_v5 = vsub.f32 %v220_v56, %v232_v3 }
 0x127   :  { %v235_v6 = vmul.f32 1.442695, %v233_v4 }
 0x128   :  { %v237_v7 = vmul.f32 1.442695, %v234_v5 }
 0x129   :  { %389 = vpow2.f32 %v235_v6 }
 0x12a   :  { %391 = vpow2.f32 %v237_v7 }
 0x133   :  { %v390_v8 = vpop.eup %389 }
 0x134   :  { %v392_v9 = vpop.eup %391  ;;  %v239_v10 = vrot.slane %v390_v8, 4 }
 0x135   :  { %v245_v11 = vrot.slane %v392_v9, 4 }
 0x136   :  { %v240_v12 = vadd.f32 %v390_v8, %v239_v10 }
 0x137   :  { %v246_v13 = vadd.f32 %v392_v9, %v245_v11 }
 0x138   :  { %v241_v14 = vrot.slane %v240_v12, 2 }
 0x139   :  { %v247_v15 = vrot.slane %v246_v13, 2 }
 0x13a   :  { %v242_v16 = vadd.f32 %v241_v14, %v240_v12 }
 0x13b   :  { %v248_v17 = vadd.f32 %v247_v15, %v246_v13 }
 0x13c   :  { %v243_v18 = vrot.slane %v242_v16, 1 }
 0x13d   :  { %v249_v19 = vrot.slane %v248_v17, 1 }
 0x13e   :  { %v244_v20 = vadd.f32 %v243_v18, %v242_v16 }
 0x13f   :  { %v250_v21 = vadd.f32 %v249_v19, %v248_v17 }
 0x140   :  { %393 = vrcp.f32 %v244_v20 }
 0x141   :  { %395 = vrcp.f32 %v250_v21 }
 0x14a   :  { %v394_v22 = vpop.eup %393 }
 0x14b   :  { %v396_v23 = vpop.eup %395  ;;  %v252_v24 = vmul.f32 %v394_v22, %v390_v8 }
 0x14c   :  { %v254_v25 = vmul.f32 %v396_v23, %v392_v9 }
 0x14d   :  { %v255_v26 = vsel %vm218_vm2, %v252_v24, %v211_v52 }
 0x14e   :  { %257 = vst [vmem:[#allocation2] sm:$0xff] %v255_v26  ;;  %v256_v27 = vsel %vm218_vm2, %v254_v25, %v213_v54 }
 0x14f   :  { %258 = vst [vmem:[#allocation2 + $0x8] sm:$0xff] %v256_v27 }
 0x150   :  { %408 = shalt.err (!%p405_p4)
}
 0x151   :  { %s409_s21 = scalar_lea.hbm %s594_s2, 256 }
 0x152   :  { %p410_p5 = scmp.ne.s32.totalorder %s594_s2, %s409_s21  ;;  %p413_p6 = scmp.lt.u32.totalorder %s409_s21, %s594_s2 }
 0x154   :  { %p415_p7 = pnand %p413_p6, %p410_p5 }
 0x156   :  { %418 = shalt.err (!%p415_p7)
}
 0x157   :  { %268 = dma.vmem_to_hbm [thread:$0]  %s266_s17, 256, %s594_s2, [#allocation3]  }
 0x158   :  { %419 = dma.done.wait [#allocation3], 256  }
 0x159   :  { %420 = vsyncadd [#allocation3], 4294967040 }
 0x15a   :  { %272 = vsyncpa [#allocation3], 1 }

</bundles_post_ra>
